<compile_context>
chip_gen: v7x
topology: tpu7x:2x2x1
jax: 0.10.0
libtpu: 0.0.40
codegen_flags: <defaults>
</compile_context>

<pallas_src>
import math
import numpy as np
import jax
import jax.numpy as jnp
from jax import lax
from jax.experimental import pallas as pl
from jax.experimental.pallas import tpu as pltpu


def _make_kernel(N, K, T, Wpad, Kout, tile_n, mxu_bf16):
    """Builds the per-tile kernel. All sizes are static Python ints (closed over)."""
    shift = Wpad - K  # roll amount that brings lane j+K (im part) onto lane j (re part)

    def kernel(p_ref, l_ref, w_ref, out_ref):
        row0 = pl.program_id(0) * tile_n
        rows = lax.broadcasted_iota(jnp.int32, (tile_n, Kout), 0) + row0
        lanes = lax.broadcasted_iota(jnp.int32, (tile_n, Kout), 1)
        # valid rows (< N; tail of the last partial block is garbage) AND in-band lanes.
        mask = (rows < N) & (lanes < K)

        w = w_ref[...]  # (T, Wpad): cos at lanes [0,K), -sin at lanes [K,2K), rest 0

        def norm_band_psd(x):
            if mxu_bf16:
                x = x.astype(jnp.bfloat16)          # in-kernel cast: free VPU, no HBM cost
            # Band-limited rFFT via one fused MXU matmul ([real | imag] packed in W).
            xf = jnp.dot(x, w, preferred_element_type=jnp.float32)   # (tile_n, Wpad)
            xsq = xf * xf
            # PSD = re^2 + im^2: fold the imag lanes onto the real lanes via an XLU roll.
            rolled = pltpu.roll(xsq, shift, axis=1)
            band = jnp.where(mask, xsq[:, :Kout] + rolled[:, :Kout], 0.0)  # (tile_n, Kout)
            # Per-row in-band power; masked lanes/rows contribute exactly 0.
            s = jnp.sum(band, axis=1, keepdims=True)
            # TODO(synk): torch yields NaN (0/0) for rows with zero in-band power; here
            # such rows (and the masked tail rows) contribute exactly 0 instead.
            s = jnp.where(s > 0.0, s, 1.0)
            return band * pl.reciprocal(s, approx=True)   # EUP slot

        p_n = norm_band_psd(p_ref[...])   # preds fully first -> shorter live ranges
        l_n = norm_band_psd(l_ref[...])

        d = p_n - l_n
        dsq = d * d                                       # (tile_n, Kout)
        # Lane-dense (8, Kout) partial SSE: fold sublane groups with a reshape + sum
        # (compiler emits a tree of VPU adds; no long serial dependency).
        out_ref[...] = jnp.sum(dsq.reshape(tile_n // 8, 8, Kout), axis=0)

    return kernel


def map_psd_mse(preds, labels, fps, f_min, f_max, *, tile_n=1024, mxu_bf16=False):
    """Pallas implementation of MapPSDMSE.forward.

    preds, labels: (B, C, H, T) arrays (temporal / FFT axis last, like the torch code).
    fps: 1-D array; fps[0] is read on host — the frequency-bin selection must be static
         (the torch module also selects indices with numpy), so this wrapper is not
         traceable under jax.jit w.r.t. fps.
    """
    B, C, H, T = preds.shape
    N = B * C * H
    fps0 = float(np.asarray(fps)[0])

    # rfftfreq(T, 1/fps0) -> static band selection (host side, same as the torch code).
    freqs = np.fft.rfftfreq(T, d=1.0 / fps0)
    sel = np.arange(len(freqs))[(freqs >= f_min) & (freqs <= f_max)]
    K = int(sel.size)
    assert K > 0, "empty frequency band"

    # Fused DFT matrix, tightly padded: cos at lanes [0,K), -sin at lanes [K,2K).
    Wpad = ((2 * K + 127) // 128) * 128     # MXU output width (single fused matmul)
    Kout = ((K + 127) // 128) * 128         # PSD / output width (lane-dense, <= Wpad)
    t = np.arange(T)[:, None]               # (T, 1)
    k = sel[None, :]                         # (1, K)
    ang = 2.0 * math.pi * t * k / T
    w = np.zeros((T, Wpad), dtype=np.float32)
    w[:, :K] = np.cos(ang)
    w[:, K:2 * K] = -np.sin(ang)             # rfft imag sign (irrelevant after squaring)
    w_dtype = jnp.bfloat16 if mxu_bf16 else jnp.float32
    w_dev = jnp.asarray(w, dtype=w_dtype)

    # ---- VMEM budget -> row-tile size -------------------------------------------------
    # Double-buffered f32 inputs (2 arrays x 2 bufs), 2 bufs of W + output, ~6 live f32
    # temporaries of width Wpad plus 2 of width Kout per row.  Budget kept at 24 MiB so
    # the 32 MiB scoped limit below holds on v5e/v6e/v7x alike.
    per_row = 4 * (4 * T + 6 * Wpad + 2 * Kout)
    fixed = 4 * (2 * T * Wpad + 2 * 8 * Kout)
    budget = 24 * 1024 * 1024
    tile_cap = max(8, ((budget - fixed) // per_row) // 8 * 8)
    TILE_N = max(8, (min(tile_n, tile_cap) // 8) * 8)
    TILE_N = min(TILE_N, ((N + 7) // 8) * 8)
    # >= 2 row tiles whenever possible so megacore (v7x) splits work across both cores.
    if N > 8 and (N + TILE_N - 1) // TILE_N < 2:
        TILE_N = max(8, (((N + 1) // 2) + 7) // 8 * 8)
    num_tiles = (N + TILE_N - 1) // TILE_N

    # Pure metadata reshape (contiguous): no HBM copy, no padding copy.
    p2d = preds.reshape(N, T)
    l2d = labels.reshape(N, T)
    if p2d.dtype != jnp.float32:
        p2d = p2d.astype(jnp.float32)
        l2d = l2d.astype(jnp.float32)

    cost = pl.CostEstimate(
        flops=int(2 * (2 * N * T * Wpad) + 12 * N * Kout),
        transcendentals=int(2 * N),
        bytes_accessed=int(2 * N * T * 4
                           + T * Wpad * w_dev.dtype.itemsize
                           + num_tiles * 8 * Kout * 4),
    )

    kernel = _make_kernel(N=N, K=K, T=T, Wpad=Wpad, Kout=Kout,
                          tile_n=TILE_N, mxu_bf16=mxu_bf16)

    partials = pl.pallas_call(
        kernel,
        grid=(num_tiles,),
        in_specs=[
            pl.BlockSpec((TILE_N, T), lambda i: (i, 0)),   # preds rows (pipelined DMA)
            pl.BlockSpec((TILE_N, T), lambda i: (i, 0)),   # labels rows (pipelined DMA)
            pl.BlockSpec((T, Wpad), lambda i: (0, 0)),     # fused DFT matrix, DMA'd once
        ],
        out_specs=pl.BlockSpec((8, Kout), lambda i: (i, 0)),  # per-tile (8,128k) partial SSE
        out_shape=jax.ShapeDtypeStruct((num_tiles * 8, Kout), jnp.float32),
        compiler_params=pltpu.CompilerParams(
            dimension_semantics=("parallel",),             # v7x: both TCs take row tiles
            vmem_limit_bytes=32 * 1024 * 1024,
        ),
        cost_estimate=cost,
    )(p2d, l2d, w_dev)

    # MSELoss averages over all kept elements: B*C*H*K (true N, padded rows/lanes are 0).
    return jnp.sum(partials) / (N * K)


def _reference(preds, labels, fps, f_min, f_max):
    """Pure-JAX reference mirroring the torch module."""
    T = preds.shape[3]
    fps0 = float(np.asarray(fps)[0])
    pf = jnp.fft.rfft(preds, axis=3)
    lf = jnp.fft.rfft(labels, axis=3)
    p_psd = jnp.real(pf) ** 2 + jnp.imag(pf) ** 2
    l_psd = jnp.real(lf) ** 2 + jnp.imag(lf) ** 2
    f = np.fft.rfftfreq(T, d=1.0 / fps0)
    idx = np.arange(len(f))[(f >= f_min) & (f <= f_max)]
    p_psd = p_psd[:, :, :, idx]
    l_psd = l_psd[:, :, :, idx]
    p_psd = p_psd / jnp.sum(p_psd, axis=3, keepdims=True)
    l_psd = l_psd / jnp.sum(l_psd, axis=3, keepdims=True)
    return jnp.mean((p_psd - l_psd) ** 2)


if __name__ == "__main__":
    key = jax.random.PRNGKey(0)
    k1, k2 = jax.random.split(key)

    # rPPG spatio-temporal map, time axis last.  H=15 makes N=90 non-divisible by the
    # chosen row tile, exercising the in-kernel tail-row masking (no wrapper-side pad).
    B, C, H, T = 2, 3, 15, 64
    preds = jax.random.normal(k1, (B, C, H, T), dtype=jnp.float32)
    labels = jax.random.normal(k2, (B, C, H, T), dtype=jnp.float32)
    fps = jnp.array([30.0], dtype=jnp.float32)
    f_min, f_max = 0.5, 3.0            # typical heart-rate band in Hz

    loss = map_psd_mse(preds, labels, fps, f_min, f_max)
    loss = jax.block_until_ready(loss)

    ref = jax.block_until_ready(_reference(preds, labels, fps, f_min, f_max))
    # Slightly relaxed vs 1e-3 to leave margin for the EUP approx reciprocal.
    np.testing.assert_allclose(np.asarray(loss), np.asarray(ref), rtol=2e-3, atol=2e-5)

    print("KERNEL_OK")
</pallas_src>

<mosaic_0001>
module attributes {stable_mosaic.version = 11 : i64} {
  func.func @kernel(%arg0: i32, %arg1: memref<48x64xf32, #tpu.memory_space<vmem>>, %arg2: memref<48x64xf32, #tpu.memory_space<vmem>>, %arg3: memref<64x128xf32, #tpu.memory_space<vmem>>, %arg4: memref<8x128xf32, #tpu.memory_space<vmem>>) attributes {dimension_semantics = [#tpu.dimension_semantics<parallel>], iteration_bounds = array<i64: 2>, scalar_prefetch = 0 : i64, scratch_operands = 0 : i64, tpu.core_type = #tpu.core_type<tc>, window_params = [{transform_indices = @transform_0, window_bounds = array<i64: 48, 64>}, {transform_indices = @transform_1, window_bounds = array<i64: 48, 64>}, {pipeline_mode = #tpu.pipeline_mode<synchronous>, transform_indices = @transform_2, window_bounds = array<i64: 64, 128>}, {transform_indices = @transform_3, window_bounds = array<i64: 8, 128>}]} {
    %c48_i32 = arith.constant 48 : i32
    %0 = arith.muli %arg0, %c48_i32 : i32
    %1 = tpu.iota {dimensions = array<i32: 0>} : vector<48x128xi32>
    %2 = vector.broadcast %0 : i32 to vector<48x128xi32>
    %3 = arith.addi %1, %2 : vector<48x128xi32>
    %4 = tpu.iota {dimensions = array<i32: 1>} : vector<48x128xi32>
    %c90_i32 = arith.constant 90 : i32
    %5 = vector.broadcast %c90_i32 : i32 to vector<48x128xi32>
    %6 = arith.cmpi slt, %3, %5 : vector<48x128xi32>
    %c5_i32 = arith.constant 5 : i32
    %7 = vector.broadcast %c5_i32 : i32 to vector<48x128xi32>
    %8 = arith.cmpi slt, %4, %7 : vector<48x128xi32>
    %9 = arith.andi %6, %8 : vector<48x128xi1>
    %c0 = arith.constant 0 : index
    %c0_0 = arith.constant 0 : index
    %10 = vector.load %arg3[%c0, %c0_0] : memref<64x128xf32, #tpu.memory_space<vmem>>, vector<64x128xf32>
    %c0_1 = arith.constant 0 : index
    %c0_2 = arith.constant 0 : index
    %11 = vector.load %arg1[%c0_1, %c0_2] : memref<48x64xf32, #tpu.memory_space<vmem>>, vector<48x64xf32>
    %cst = arith.constant dense<0.000000e+00> : vector<48x128xf32>
    %12 = tpu.matmul %11, %10, %cst {dimension_numbers = #tpu.dot_dimension_numbers<[1], [0], [0], [1], [0, 0, 1, 1], [], []>} : vector<48x64xf32>, vector<64x128xf32>, vector<48x128xf32> -> vector<48x128xf32>
    %13 = arith.mulf %12, %12 : vector<48x128xf32>
    %c123_i32 = arith.constant 123 : i32
    %14 = tpu.dynamic_rotate %13 by %c123_i32 dim 1 : vector<48x128xf32>, i32 -> vector<48x128xf32>
    %15 = arith.addf %13, %14 : vector<48x128xf32>
    %cst_3 = arith.constant 0.000000e+00 : f32
    %16 = vector.broadcast %cst_3 : f32 to vector<48x128xf32>
    %17 = arith.select %9, %15, %16 : vector<48x128xi1>, vector<48x128xf32>
    %cst_4 = arith.constant dense<0.000000e+00> : vector<48xf32>
    %18 = vector.multi_reduction <add>, %17, %cst_4 [1] : vector<48x128xf32> to vector<48xf32>
    %19 = vector.shape_cast %18 : vector<48xf32> to vector<48x1xf32>
    %cst_5 = arith.constant 0.000000e+00 : f32
    %20 = vector.broadcast %cst_5 : f32 to vector<48x1xf32>
    %21 = arith.cmpf ogt, %19, %20 : vector<48x1xf32>
    %cst_6 = arith.constant 1.000000e+00 : f32
    %22 = vector.broadcast %cst_6 : f32 to vector<48x1xf32>
    %23 = arith.select %21, %19, %22 : vector<48x1xi1>, vector<48x1xf32>
    %24 = tpu.reciprocal %23 {approx = true} : vector<48x1xf32> -> vector<48x1xf32>
    %25 = vector.broadcast %24 : vector<48x1xf32> to vector<48x128xf32>
    %26 = arith.mulf %17, %25 : vector<48x128xf32>
    %c0_7 = arith.constant 0 : index
    %c0_8 = arith.constant 0 : index
    %27 = vector.load %arg2[%c0_7, %c0_8] : memref<48x64xf32, #tpu.memory_space<vmem>>, vector<48x64xf32>
    %cst_9 = arith.constant dense<0.000000e+00> : vector<48x128xf32>
    %28 = tpu.matmul %27, %10, %cst_9 {dimension_numbers = #tpu.dot_dimension_numbers<[1], [0], [0], [1], [0, 0, 1, 1], [], []>} : vector<48x64xf32>, vector<64x128xf32>, vector<48x128xf32> -> vector<48x128xf32>
    %29 = arith.mulf %28, %28 : vector<48x128xf32>
    %c123_i32_10 = arith.constant 123 : i32
    %30 = tpu.dynamic_rotate %29 by %c123_i32_10 dim 1 : vector<48x128xf32>, i32 -> vector<48x128xf32>
    %31 = arith.addf %29, %30 : vector<48x128xf32>
    %cst_11 = arith.constant 0.000000e+00 : f32
    %32 = vector.broadcast %cst_11 : f32 to vector<48x128xf32>
    %33 = arith.select %9, %31, %32 : vector<48x128xi1>, vector<48x128xf32>
    %cst_12 = arith.constant dense<0.000000e+00> : vector<48xf32>
    %34 = vector.multi_reduction <add>, %33, %cst_12 [1] : vector<48x128xf32> to vector<48xf32>
    %35 = vector.shape_cast %34 : vector<48xf32> to vector<48x1xf32>
    %cst_13 = arith.constant 0.000000e+00 : f32
    %36 = vector.broadcast %cst_13 : f32 to vector<48x1xf32>
    %37 = arith.cmpf ogt, %35, %36 : vector<48x1xf32>
    %cst_14 = arith.constant 1.000000e+00 : f32
    %38 = vector.broadcast %cst_14 : f32 to vector<48x1xf32>
    %39 = arith.select %37, %35, %38 : vector<48x1xi1>, vector<48x1xf32>
    %40 = tpu.reciprocal %39 {approx = true} : vector<48x1xf32> -> vector<48x1xf32>
    %41 = vector.broadcast %40 : vector<48x1xf32> to vector<48x128xf32>
    %42 = arith.mulf %33, %41 : vector<48x128xf32>
    %43 = arith.subf %26, %42 : vector<48x128xf32>
    %44 = arith.mulf %43, %43 : vector<48x128xf32>
    %45 = vector.shape_cast %44 : vector<48x128xf32> to vector<6x8x128xf32>
    %cst_15 = arith.constant dense<0.000000e+00> : vector<8x128xf32>
    %46 = vector.multi_reduction <add>, %45, %cst_15 [0] : vector<6x8x128xf32> to vector<8x128xf32>
    %c0_16 = arith.constant 0 : index
    %c0_17 = arith.constant 0 : index
    %47 = vector.load %arg4[%c0_16, %c0_17] : memref<8x128xf32, #tpu.memory_space<vmem>>, vector<8x128xf32>
    tpu.vector_store %arg4[%c0_16, %c0_17], %46 {strides = array<i32>} : memref<8x128xf32, #tpu.memory_space<vmem>>, vector<8x128xf32>,
    return
  }
  func.func @transform_0(%arg0: i32) -> (i32, i32) {
    %c0_i32 = arith.constant 0 : i32
    %c0_i32_0 = arith.constant 0 : i32
    return %arg0, %c0_i32 : i32, i32
  }
  func.func @transform_1(%arg0: i32) -> (i32, i32) {
    %c0_i32 = arith.constant 0 : i32
    %c0_i32_0 = arith.constant 0 : i32
    return %arg0, %c0_i32 : i32, i32
  }
  func.func @transform_2(%arg0: i32) -> (i32, i32) {
    %c0_i32 = arith.constant 0 : i32
    %c0_i32_0 = arith.constant 0 : i32
    %c0_i32_1 = arith.constant 0 : i32
    return %c0_i32, %c0_i32_0 : i32, i32
  }
  func.func @transform_3(%arg0: i32) -> (i32, i32) {
    %c0_i32 = arith.constant 0 : i32
    %c0_i32_0 = arith.constant 0 : i32
    return %arg0, %c0_i32 : i32, i32
  }
}

</mosaic_0001>

<bundles_post_ra>
// kernel: tpu_custom_call.1
= control target key start
LH: loop header
LB: loop body
LE: loop exit
PB: predicated region body
PF: predicated region fallthrough
CT: control target
= control target key end

     0   :  { %8 = vsyncpa [#allocation3], 0  ;;  %s1229_s0 = inlined_call_operand.vmem [shape: f32[90,64], index: 0, kind: input, shape index: {}]   ;;  %s1230_s1 = inlined_call_operand.vmem [shape: f32[90,64], index: 1, kind: input, shape index: {}]   ;;  %s1231_s2 = inlined_call_operand.vmem [shape: f32[64,128], index: 2, kind: input, shape index: {}]   ;;  %s1232_s3 = inlined_call_operand.hbm [shape: f32[16,128], index: 3, kind: output, shape index: {}]  }
   0x1   :  { %10 = vsyncpa [#allocation3 + $0x1], 0  ;;  %s988_s12 = smov 0   ;;  %s990_s13 = smov 0  }
   0x2   :  { %s992_s14 = smov 0   ;;  %s994_s15 = smov 0  }
   0x3 LB: > { %s1009_s16 = sadd.s32 4294967295, %s964_s15   ;;  %s705_s17 = sadd.s32 4294967294, %s964_s15   ;;  %s964_s15 = sphi %s994_s15, %s1242_s15   ;;  %s960_s14 = sphi %s992_s14, %s1241_s14   ;;  %s956_s13 = sphi %s990_s13, %s1240_s13   ;;  %s952_s12 = sphi %s988_s12, %s1239_s12  }
   0x4   : > { %s1013_s18 = sadd.s32 1, %s964_s15   ;;  %s96_s19 = sadd.s32 1, %s960_s14 }
   0x5   : > { %s93_s20 = ssub.s32 %s964_s15, %s1013_s18  ;;  %p106_p0 = scmp.ne.s32.totalorder %s960_s14, %s956_s13 }
   0x6   : > { %p94_p1 = scmp.eq.s32.totalorder %s93_s20, 0  ;;  %p107_p2 = scmp.eq.s32.totalorder %s1009_s16, 1 }
   0x7   : > { %p112_p3 = scmp.ne.s32.totalorder %s956_s13, %s952_s12  ;;  %p113_p4 = scmp.eq.s32.totalorder %s705_s17, 1 }
   0x8   : > { %s1024_s21 = scalar_select %p94_p1, %s960_s14, %s96_s19  }
   0x9   : > { %p1026_p5 = por %p107_p2, %p106_p0  ;;  %p1030_p6 = por %p113_p4, %p112_p3 }
   0xa   : > { %p708_p7 = scmp.ge.s32.totalorder %s964_s15, 1  ;;  %p152_p8 = scmp.lt.s32.totalorder %s964_s15, 3 }
   0xc   : > { %p153_p9 = pnand %p708_p7, %p152_p8 }
   0xd   : > { %v223_v0 = vld [vmem:[%s1231_s2] sm:$0xff] (!%p153_p9)  ;;  %v224_v1 = vld [vmem:[%s1231_s2 + $0x8] sm:$0xff] (!%p153_p9)  ;;  %v225_v2 = vld [vmem:[%s1231_s2 + $0x10] sm:$0xff] (!%p153_p9)  ;;  %s181_s30 = smul.u32 (!%p153_p9), 6, %s1009_s16  ;;  %vm237_vm0 = vcmask (!%p153_p9), 523264   ;;  %v194_v48 = vlaneseq (!%p153_p9)  ;;  %s178_s5 = sand.u32 (!%p153_p9), 1, %s956_s13  }
   0xe   : > { %156 = sbr.rel (%p153_p9) target bundleno = 566 (0x236), region = 32  ;;  %v806_v3 = vpack.c.bf16 (!%p153_p9), %v224_v1, %v223_v0  ;;  %v226_v4 = vld [vmem:[%s1231_s2 + $0x18] sm:$0xff] (!%p153_p9)  ;;  %v227_v6 = vld [vmem:[%s1231_s2 + $0x20] sm:$0xff] (!%p153_p9)  ;;  %v228_v7 = vld [vmem:[%s1231_s2 + $0x28] sm:$0xff] (!%p153_p9)  ;;  %s709_s6 = sshll.u32 (!%p153_p9), %s178_s5, 3 }
   0xf   : > { %v810_v5 = vpack.c.bf16 (!%p153_p9), %v226_v4, %v225_v2  ;;  %p182_p10 = scmp.lt.s32.totalorder (!%p153_p9), %s181_s30, 11  ;;  %v814_v8 = vpack.c.bf16 (!%p153_p9), %v228_v7, %v227_v6  ;;  %v229_v9 = vld [vmem:[%s1231_s2 + $0x30] sm:$0xff] (!%p153_p9)  ;;  %v230_v10 = vld [vmem:[%s1231_s2 + $0x38] sm:$0xff] (!%p153_p9)  ;;  %v195_v49 = vshrl.u32 (!%p153_p9), %v194_v48, 7  ;;  %s193_s4 = smul.u32 (!%p153_p9), 48, %s1009_s16  ;;  %v209_v53 = vand.u32 (!%p153_p9), 127, %v194_v48 }
  0x10   : > { %807 = vmatprep.subr.bf16.mxu0 (!%p153_p9), %v806_v3  ;;  %823 = vmatprep.subr.bf16.mxu1 (!%p153_p9), %v806_v3  ;;  %v818_v13 = vpack.c.bf16 (!%p153_p9), %v230_v10, %v229_v9  ;;  %s725_s7 = sshll.u32 (!%p153_p9), %s1009_s16, 7  ;;  %s180_s8 = scalar_lea.vmem (!%p153_p9), [#allocation2], %s709_s6 }
  0x11   : > { %809 = vmatpush3.bf16.msra.mxu0 (!%p153_p9), %v806_v3  ;;  %825 = vmatpush3.bf16.msra.mxu1 (!%p153_p9), %v806_v3  ;;  %v196_v50 = vadd.s32 (!%p153_p9), 8, %v195_v49  ;;  %v201_v51 = vstv (!%p153_p9), %s193_s4  ;;  %vm216_vm2 = vcmp.lt.s32.totalorder (!%p153_p9), %v209_v53, 5  ;;  %v198_v55 = vadd.s32 (!%p153_p9), 24, %v195_v49  ;;  %s634_s9 = sshll.u32 (!%p153_p9), %s180_s8, 4  ;;  %s1187_s17 = scalar_lea.hbm (!%p153_p9), %s1232_s3, %s725_s7  ;;  %s1189_s9 = int_to_ptr.vmem [resolvable:$true] %s634_s9 }
  0x12   : > { %811 = vmatprep.subr.bf16.mxu0 (!%p153_p9), %v810_v5  ;;  %827 = vmatprep.subr.bf16.mxu1 (!%p153_p9), %v810_v5  ;;  %v202_v54 = vadd.s32 (!%p153_p9), %v201_v51, %v195_v49  ;;  %v197_v61 = vadd.s32 (!%p153_p9), 16, %v195_v49  ;;  %s621_s19 = scalar_lea.sflag (!%p153_p9), [#allocation3], %s178_s5  ;;  %s967_s16 = smov (!%p153_p9), [#allocation2]  }
  0x13   : > { %v203_v52 = vadd.s32 (!%p153_p9), %v201_v51, %v196_v50  ;;  %v205_v60 = vadd.s32 (!%p153_p9), %v201_v51, %v198_v55  ;;  %s906_s24 = sshll.u32 (!%p153_p9), %s967_s16, 4  ;;  %s907_s24 = int_to_ptr.vmem [resolvable:$false] %s906_s24 }
  0x14   : > { %vm210_vm4 = vcmp.lt.s32.totalorder (!%p153_p9), %v202_v54, 90  ;;  %v204_v4 = vadd.s32 (!%p153_p9), %v201_v51, %v197_v61  ;;  %s908_s25 = scalar_lea.vmem (!%p153_p9), %s907_s24, 256  ;;  %p909_p0 = scmp.lt.s32.totalorder (!%p153_p9), %s1189_s9, %s907_s24 }
  0x15   : > { %s1244_s30 = smov (!%p182_p10, %s181_s30), 11  ;;  %813 = vmatpush3.bf16.msra.mxu0 %v810_v5  ;;  %829 = vmatpush3.bf16.msra.mxu1 %v810_v5  ;;  %vm211_vm1 = vcmp.lt.s32.totalorder %v203_v52, 90  ;;  %vm1116_vm5 = vmand %vm210_vm4, %vm216_vm2  ;;  %vm213_vm6 = vcmp.lt.s32.totalorder %v205_v60, 90  ;;  %v199_v5 = vadd.s32 32, %v195_v49 }
  0x16   : > { %s710_s20 = sshll.u32 %s1244_s30, 3  ;;  %815 = vmatprep.subr.bf16.mxu0 %v814_v8  ;;  %831 = vmatprep.subr.bf16.mxu1 %v814_v8  ;;  %s966_s30 = smov 123   ;;  %vm218_vm3 = vmand %vm211_vm1, %vm216_vm2  ;;  %vm212_vm8 = vcmp.lt.s32.totalorder %v204_v4, 90 }
  0x17   : > { %s1064_s26 = scalar_lea.vmem %s1229_s0, %s710_s20  ;;  %s1069_s29 = scalar_lea.vmem %s1230_s1, %s710_s20  ;;  %vm1126_vm7 = vmand %vm213_vm6, %vm216_vm2 }
  0x18   : > { %v231_v11 = vld [vmem:[%s1064_s26] sm:$0xff]  ;;  %v232_v14 = vld [vmem:[%s1064_s26 + $0x8] sm:$0xff]  ;;  %v233_v16 = vld [vmem:[%s1064_s26 + $0x10] sm:$0xff]  ;;  %s902_s20 = scalar_lea.vmem %s1189_s9, 128 }
  0x19   : > { %v417_v12 = vld [vmem:[%s1069_s29] sm:$0xff]  ;;  %772 = vmatprep.mubr.msk.f32.mxu0 %vm237_vm0, %v231_v11  ;;  %817 = vmatpush3.bf16.msra.mxu0 %v814_v8  ;;  %v418_v15 = vld [vmem:[%s1069_s29 + $0x8] sm:$0xff]  ;;  %v419_v17 = vld [vmem:[%s1069_s29 + $0x10] sm:$0xff]  ;;  %p903_p11 = scmp.ne.s32.totalorder %s1189_s9, %s902_s20  ;;  %p910_p1 = scmp.lt.s32.totalorder %s908_s25, %s902_s20 }
  0x1a   : > { %797 = vmatprep.mubr.msk.f32.mxu1 %vm237_vm0, %v417_v12  ;;  %833 = vmatpush3.bf16.msra.mxu1 %v814_v8  ;;  %v234_v18 = vld [vmem:[%s1064_s26 + $0x18] sm:$0xff]  ;;  %v235_v20 = vld [vmem:[%s1064_s26 + $0x20] sm:$0xff]  ;;  %v236_v22 = vld [vmem:[%s1064_s26 + $0x28] sm:$0xff]  ;;  %v206_v12 = vadd.s32 %v201_v51, %v199_v5 }
  0x1b   : > { %819 = vmatprep.subr.bf16.mxu0 %v818_v13  ;;  %835 = vmatprep.subr.bf16.mxu1 %v818_v13  ;;  %v420_v19 = vld [vmem:[%s1069_s29 + $0x18] sm:$0xff]  ;;  %v421_v21 = vld [vmem:[%s1069_s29 + $0x20] sm:$0xff]  ;;  %v422_v23 = vld [vmem:[%s1069_s29 + $0x28] sm:$0xff]  ;;  %p904_p12 = pnand %p903_p11, %p1026_p5  ;;  %p911_p2 = por %p910_p1, %p909_p0 }
  0x1c   : > { %vm219_vm9 = vmand %vm212_vm8, %vm216_vm2  ;;  %vm214_vm10 = vcmp.lt.s32.totalorder %v206_v12, 90 }
  0x1d   : > { %821 = vmatpush3.bf16.msra.mxu0 %v818_v13  ;;  %vm221_vm11 = vmand %vm214_vm10, %vm216_vm2  ;;  %p905_p13 = pneg %p904_p12 }
  0x1e   : > { %837 = vmatpush3.bf16.msra.mxu1 %v818_v13  ;;  %v200_v13 = vadd.s32 40, %v195_v49 }
  0x1f   : > { %p912_p3 = pnand %p911_p2, %p905_p13 }
  0x20   : > { %773 = vmatmul.mubr.msk.f32.vlgmr.msra.gmra.mrb[0].mxu0 %vm237_vm0, %v232_v14 }
  0x21   : > { %798 = vmatmul.mubr.msk.f32.vlgmr.msra.gmra.mrb[0].mxu1 %vm237_vm0, %v418_v15  ;;  %775 = vmatprep.mubr.msk.f32.mxu0 %vm237_vm0, %v233_v16 }
  0x22   : > { %800 = vmatprep.mubr.msk.f32.mxu1 %vm237_vm0, %v419_v17 }
  0x24   : > { %776 = vmatmul.mubr.msk.f32.gmra.mrb[2].mxu0 %vm237_vm0, %v234_v18 }
  0x25   : > { %801 = vmatmul.mubr.msk.f32.gmra.mrb[2].mxu1 %vm237_vm0, %v420_v19  ;;  %778 = vmatprep.mubr.msk.f32.mxu0 %vm237_vm0, %v235_v20  ;;  %v207_v20 = vadd.s32 %v201_v51, %v200_v13 }
  0x26   : > { %803 = vmatprep.mubr.msk.f32.mxu1 %vm237_vm0, %v421_v21 }
  0x27   : > { %vm215_vm12 = vcmp.lt.s32.totalorder %v207_v20, 90 }
  0x28   : > { %779 = vmatmul.mubr.msk.f32.gmra.mrb[4].mxu0 %vm237_vm0, %v236_v22  ;;  %vm222_vm13 = vmand %vm215_vm12, %vm216_vm2 }
  0x29   : > { %804 = vmatmul.mubr.msk.f32.gmra.mrb[4].mxu1 %vm237_vm0, %v422_v23 }
  0xf3   : > { %v774_v24 = vpop.f32.mrb[0].mxu0 }
  0xf4   : > { %v799_v25 = vpop.f32.mrb[0].mxu1  ;;  %v352_v26 = vmul.f32 %v774_v24, %v774_v24  ;;  %v322_v28 = vpop.f32.mrb[1].mxu0 }
  0xf5   : > { %v537_v27 = vmul.f32 %v799_v25, %v799_v25  ;;  %v507_v29 = vpop.f32.mrb[1].mxu1  ;;  %v351_v32 = vmul.f32 %v322_v28, %v322_v28 }
  0xf6   : > { %359 = vrot.lane.b32.xlu0 %v352_v26, %s966_s30  ;;  %v536_v33 = vmul.f32 %v507_v29, %v507_v29 }
  0xf7   : > { %544 = vrot.lane.b32.xlu1 %v537_v27, %s966_s30  ;;  %v777_v30 = vpop.f32.mrb[2].mxu0 }
  0xf8   : > { %v802_v31 = vpop.f32.mrb[2].mxu1  ;;  %v332_v34 = vpop.f32.mrb[3].mxu0  ;;  %v354_v36 = vmul.f32 %v777_v30, %v777_v30 }
  0xf9   : > { %v517_v35 = vpop.f32.mrb[3].mxu1  ;;  %v539_v37 = vmul.f32 %v802_v31, %v802_v31  ;;  %v353_v42 = vmul.f32 %v332_v34, %v332_v34 }
  0xfa   : > { %357 = vrot.lane.b32.xlu0 %v351_v32, %s966_s30  ;;  %v538_v43 = vmul.f32 %v517_v35, %v517_v35 }
  0xfb   : > { %542 = vrot.lane.b32.xlu1 %v536_v33, %s966_s30  ;;  %v780_v39 = vpop.f32.mrb[4].mxu0 }
  0xfc   : > { %v805_v38 = vpop.f32.mrb[4].mxu1  ;;  %v342_v40 = vpop.f32.mrb[5].mxu0  ;;  %v1101_v47 = vmul.f32 %v780_v39, %v780_v39 }
  0xfd   : > { %v527_v41 = vpop.f32.mrb[5].mxu1  ;;  %v1095_v44 = vmul.f32 %v342_v40, %v342_v40  ;;  %v1099_v46 = vmul.f32 %v805_v38, %v805_v38 }
  0xfe   : > { %363 = vrot.lane.b32.xlu0 %v354_v36, %s966_s30  ;;  %v1097_v45 = vmul.f32 %v527_v41, %v527_v41 }
  0xff   : > { %548 = vrot.lane.b32.xlu1 %v539_v37, %s966_s30 }
 0x102   : > { %361 = vrot.lane.b32.xlu0 %v353_v42, %s966_s30 }
 0x103   : > { %546 = vrot.lane.b32.xlu1 %v538_v43, %s966_s30 }
 0x106   : > { %365 = vrot.lane.b32.xlu0 %v1095_v44, %s966_s30 }
 0x107   : > { %550 = vrot.lane.b32.xlu1 %v1097_v45, %s966_s30 }
 0x10a   : > { %367 = vrot.lane.b32.xlu0 %v1101_v47, %s966_s30 }
 0x10b   : > { %552 = vrot.lane.b32.xlu1 %v1099_v46, %s966_s30 }
 0x168   : > { %v360_v57 = vpop.permute.xlu0 %359 }
 0x169   : > { %v545_v56 = vpop.permute.xlu1 %544  ;;  %v370_v59 = vadd.f32 %v360_v57, %v352_v26 }
 0x16a   : > { %v555_v58 = vadd.f32 %v545_v56, %v537_v27 }
 0x16b   : > { %v1109_v62 = vsel %vm218_vm3, %v370_v59, 0.0 }
 0x16c   : > { %v1111_v63 = vsel %vm218_vm3, %v555_v58, 0.0  ;;  %383 = vadd.xlane.f32.xlu1 %v1109_v62  ;;  %v358_v1 = vpop.permute.xlu0 %357 }
 0x16d   : > { %v543_v0 = vpop.permute.xlu1 %542  ;;  %568 = vadd.xlane.f32.xlu0 %v1111_v63  ;;  %v369_v3 = vadd.f32 %v358_v1, %v351_v32 }
 0x16e   : > { %v554_v6 = vadd.f32 %v543_v0, %v536_v33 }
 0x16f   : > { %v1122_v7 = vsel %vm1116_vm5, %v369_v3, 0.0 }
 0x170   : > { %v364_v9 = vpop.permute.xlu0 %363  ;;  %v1136_v16 = vsel %vm1116_vm5, %v554_v6, 0.0 }
 0x171   : > { %v549_v8 = vpop.permute.xlu1 %548  ;;  %381 = vadd.xlane.f32.xlu0 %v1122_v7  ;;  %v372_v11 = vadd.f32 %v364_v9, %v354_v36 }
 0x172   : > { %v557_v14 = vadd.f32 %v549_v8, %v539_v37 }
 0x173   : > { %v1132_v15 = vsel %vm1126_vm7, %v372_v11, 0.0 }
 0x174   : > { %387 = vadd.xlane.f32.xlu1 %v1132_v15  ;;  %v362_v18 = vpop.permute.xlu0 %361  ;;  %v1145_v23 = vsel %vm1126_vm7, %v557_v14, 0.0 }
 0x175   : > { %v547_v17 = vpop.permute.xlu1 %546  ;;  %566 = vadd.xlane.f32.xlu0 %v1136_v16  ;;  %v371_v19 = vadd.f32 %v362_v18, %v353_v42 }
 0x176   : > { %v556_v21 = vadd.f32 %v547_v17, %v538_v43 }
 0x177   : > { %v1141_v22 = vsel %vm219_vm9, %v371_v19, 0.0 }
 0x178   : > { %385 = vadd.xlane.f32.xlu1 %v1141_v22  ;;  %v366_v25 = vpop.permute.xlu0 %365  ;;  %v1152_v28 = vsel %vm219_vm9, %v556_v21, 0.0 }
 0x179   : > { %v551_v24 = vpop.permute.xlu1 %550  ;;  %572 = vadd.xlane.f32.xlu0 %v1145_v23  ;;  %v373_v26 = vadd.f32 %v366_v25, %v1095_v44 }
 0x17a   : > { %v558_v27 = vadd.f32 %v551_v24, %v1097_v45 }
 0x17b   : > { %v1154_v29 = vsel %vm221_vm11, %v373_v26, 0.0 }
 0x17c   : > { %389 = vadd.xlane.f32.xlu1 %v1154_v29  ;;  %v368_v31 = vpop.permute.xlu0 %367  ;;  %v1161_v34 = vsel %vm221_vm11, %v558_v27, 0.0 }
 0x17d   : > { %v553_v30 = vpop.permute.xlu1 %552  ;;  %570 = vadd.xlane.f32.xlu0 %v1152_v28  ;;  %v374_v32 = vadd.f32 %v368_v31, %v1101_v47 }
 0x17e   : > { %v559_v33 = vadd.f32 %v553_v30, %v1099_v46 }
 0x17f   : > { %v1163_v35 = vsel %vm222_vm13, %v374_v32, 0.0 }
 0x180   : > { %391 = vadd.xlane.f32.xlu1 %v1163_v35  ;;  %v1167_v36 = vsel %vm222_vm13, %v559_v33, 0.0 }
 0x181   : > { %574 = vadd.xlane.f32.xlu0 %v1161_v34 }
 0x185   : > { %576 = vadd.xlane.f32.xlu0 %v1167_v36 }
 0x1f9   : > { %v384_v37 = vpop.xlane.xlu1 %383 }
 0x1fa   : > { %v569_v38 = vpop.xlane.xlu0 %568  ;;  %vm394_vm14 = vcmp.gt.f32.partialorder %v384_v37, 0.0 }
 0x1fb   : > { %vm579_vm15 = vcmp.gt.f32.partialorder %v569_v38, 0.0  ;;  %v400_v40 = vsel %vm394_vm14, %v384_v37, 1.0 }
 0x1fc   : > { %v585_v41 = vsel %vm579_vm15, %v569_v38, 1.0  ;;  %878 = vrcp.f32 %v400_v40 }
 0x1fd   : > { %880 = vrcp.f32 %v585_v41 }
 0x1fe   : > { %v382_v39 = vpop.xlane.xlu0 %381 }
 0x1ff   : > { %vm393_vm0 = vcmp.gt.f32.partialorder %v382_v39, 0.0 }
 0x200   : > { %v399_v42 = vsel %vm393_vm0, %v382_v39, 1.0 }
 0x201   : > { %v388_v43 = vpop.xlane.xlu1 %387  ;;  %882 = vrcp.f32 %v399_v42 }
 0x202   : > { %v567_v44 = vpop.xlane.xlu0 %566  ;;  %vm396_vm2 = vcmp.gt.f32.partialorder %v388_v43, 0.0 }
 0x203   : > { %vm578_vm1 = vcmp.gt.f32.partialorder %v567_v44, 0.0  ;;  %v402_v48 = vsel %vm396_vm2, %v388_v43, 1.0 }
 0x204   : > { %v584_v45 = vsel %vm578_vm1, %v567_v44, 1.0 }
 0x205   : > { %884 = vrcp.f32 %v584_v45  ;;  %v386_v46 = vpop.xlane.xlu1 %385 }
 0x206   : > { %v573_v47 = vpop.xlane.xlu0 %572  ;;  %vm395_vm3 = vcmp.gt.f32.partialorder %v386_v46, 0.0  ;;  %v879_v54 = vpop.eup %878 }
 0x207   : > { %vm581_vm4 = vcmp.gt.f32.partialorder %v573_v47, 0.0  ;;  %v401_v50 = vsel %vm395_vm3, %v386_v46, 1.0  ;;  %v881_v56 = vpop.eup %880  ;;  %v412_v2 = vmul.f32 %v879_v54, %v1109_v62 }
 0x208   : > { %v587_v49 = vsel %vm581_vm4, %v573_v47, 1.0  ;;  %v597_v4 = vmul.f32 %v881_v56, %v1111_v63 }
 0x209   : > { %886 = vrcp.f32 %v587_v49  ;;  %v390_v51 = vpop.xlane.xlu1 %389 }
 0x20a   : > { %v571_v52 = vpop.xlane.xlu0 %570  ;;  %888 = vrcp.f32 %v402_v48  ;;  %vm397_vm5 = vcmp.gt.f32.partialorder %v390_v51, 0.0  ;;  %v603_v12 = vsub.f32 %v412_v2, %v597_v4 }
 0x20b   : > { %vm580_vm6 = vcmp.gt.f32.partialorder %v571_v52, 0.0  ;;  %890 = vrcp.f32 %v401_v50  ;;  %v403_v55 = vsel %vm397_vm5, %v390_v51, 1.0  ;;  %v883_v59 = vpop.eup %882 }
 0x20c   : > { %v586_v53 = vsel %vm580_vm6, %v571_v52, 1.0  ;;  %v411_v5 = vmul.f32 %v883_v59, %v1122_v7  ;;  %v609_v20 = vmul.f32 %v603_v12, %v603_v12 }
 0x20d   : > { %892 = vrcp.f32 %v586_v53  ;;  %v392_v57 = vpop.xlane.xlu1 %391 }
 0x20e   : > { %v575_v58 = vpop.xlane.xlu0 %574  ;;  %vm398_vm7 = vcmp.gt.f32.partialorder %v392_v57, 0.0  ;;  %894 = vrcp.f32 %v403_v55 }
 0x20f   : > { %vm582_vm8 = vcmp.gt.f32.partialorder %v575_v58, 0.0  ;;  %v885_v60 = vpop.eup %884  ;;  %v404_v61 = vsel %vm398_vm7, %v392_v57, 1.0 }
 0x210   : > { %v588_v0 = vsel %vm582_vm8, %v575_v58, 1.0  ;;  %v596_v1 = vmul.f32 %v885_v60, %v1136_v16 }
 0x211   : > { %896 = vrcp.f32 %v588_v0 }
 0x212   : > { %v577_v3 = vpop.xlane.xlu0 %576  ;;  %898 = vrcp.f32 %v404_v61  ;;  %v602_v10 = vsub.f32 %v411_v5, %v596_v1 }
 0x213   : > { %vm583_vm9 = vcmp.gt.f32.partialorder %v577_v3, 0.0  ;;  %v887_v6 = vpop.eup %886 }
 0x214   : > { %v589_v8 = vsel %vm583_vm9, %v577_v3, 1.0  ;;  %v889_v9 = vpop.eup %888  ;;  %v599_v13 = vmul.f32 %v887_v6, %v1145_v23  ;;  %v608_v7 = vmul.f32 %v602_v10, %v602_v10 }
 0x215   : > { %900 = vrcp.f32 %v589_v8  ;;  %v891_v11 = vpop.eup %890  ;;  %v414_v62 = vmul.f32 %v889_v9, %v1132_v15 }
 0x216   : > { %v413_v16 = vmul.f32 %v891_v11, %v1141_v22  ;;  %v614_v15 = vadd.f32 %v609_v20, %v608_v7 }
 0x217   : > { %v893_v14 = vpop.eup %892  ;;  %v605_v19 = vsub.f32 %v414_v62, %v599_v13 }
 0x218   : > { %v598_v63 = vmul.f32 %v893_v14, %v1152_v28  ;;  %v895_v17 = vpop.eup %894 }
 0x219   : > { %v415_v25 = vmul.f32 %v895_v17, %v1154_v29  ;;  %v611_v30 = vmul.f32 %v605_v19, %v605_v19 }
 0x21a   : > { %v604_v18 = vsub.f32 %v413_v16, %v598_v63 }
 0x21b   : > { %v897_v21 = vpop.eup %896 }
 0x21c   : > { %v899_v24 = vpop.eup %898  ;;  %v600_v23 = vmul.f32 %v897_v21, %v1161_v34  ;;  %v610_v26 = vmul.f32 %v604_v18, %v604_v18 }
 0x21d   : > { %v416_v31 = vmul.f32 %v899_v24, %v1163_v35 }
 0x21e   : > { %v606_v22 = vsub.f32 %v415_v25, %v600_v23  ;;  %v615_v28 = vadd.f32 %v614_v15, %v610_v26 }
 0x21f   : > { %v901_v27 = vpop.eup %900 }
 0x220   : > { %v601_v32 = vmul.f32 %v901_v27, %v1167_v36  ;;  %v612_v33 = vmul.f32 %v606_v22, %v606_v22  ;;  %v616_v37 = vadd.f32 %v615_v28, %v611_v30 }
 0x222   : > { %v607_v38 = vsub.f32 %v416_v31, %v601_v32  ;;  %v617_v39 = vadd.f32 %v616_v37, %v612_v33 }
 0x224   : > { %v613_v29 = vmul.f32 %v607_v38, %v607_v38 }
 0x226   : > { %v618_v34 = vadd.f32 %v617_v39, %v613_v29 }
 0x228   : > { %619 = vst [vmem:[%s180_s8] sm:$0xff] %v618_v34 }
 0x229   : > { %915 = shalt.err (!%p912_p3)
}
 0x22a   : > { %s916_s26 = scalar_lea.hbm %s1187_s17, 128  ;;  %s920_s29 = scalar_lea.hbm %s1232_s3, 256 }
 0x22b   : > { %p917_p4 = scmp.ne.s32.totalorder %s1187_s17, %s916_s26  ;;  %p921_p9 = scmp.lt.u32.totalorder %s1187_s17, %s1232_s3 }
 0x22c   : > { %p922_p10 = scmp.lt.u32.totalorder %s920_s29, %s916_s26  ;;  %p924_p12 = scmp.lt.u32.totalorder %s916_s26, %s1187_s17 }
 0x22d   : > { %p918_p7 = pnand %p917_p4, %p1026_p5 }
 0x22e   : > { %p923_p11 = por %p922_p10, %p921_p9 }
 0x22f   : > { %p919_p8 = pneg %p918_p7 }
 0x230   : > { %p925_p13 = por %p924_p12, %p923_p11 }
 0x232   : > { %p926_p0 = pnand %p925_p13, %p919_p8 }
 0x234   : > { %929 = shalt.err (!%p926_p0)
}
 0x235   : > { %838 = dma.vmem_to_hbm [thread:$0]  (%p1026_p5), %s1189_s9, 128, %s1187_s17, %s621_s19  }
 0x236 PF: > { %p844_p1 = scmp.ge.s32.totalorder %s964_s15, 2  ;;  %s646_s5 = sand.u32 1, %s952_s12  }
 0x237   : > { %s647_s6 = scalar_lea.sflag [#allocation3], %s646_s5 }
 0x238   : > { %p841_p2 = pnand %p844_p1, %p1030_p6 }
 0x23a   : > { %947 = dma.done.wait (!%p841_p2), %s647_s6, 128  }
 0x23b   : > { %949 = vsyncadd (!%p841_p2), %s647_s6, 4294967168  ;;  %p13_p3 = scmp.ge.s32.totalorder %s1013_s18, 4   ;;  %s1239_s12 = smov %s956_s13 }
 0x23c   : > { %s1240_s13 = smov %s960_s14  ;;  %s1241_s14 = smov %s1024_s21 }
 0x23d   : > { %s1242_s15 = smov %s1013_s18  ;;  %15 = sbr.rel (!%p13_p3) target bundleno = 3 (0x3), region = 70 }
 0x244   :  { %652 = vsyncpa [#allocation3], 1 }
 0x245   :  { %654 = vsyncpa [#allocation3 + $0x1], 1 }

</bundles_post_ra>
